<compile_context>
chip_gen: v5e
topology: v5e:2x2
jax: 0.10.0
libtpu: 0.0.40
codegen_flags: <defaults>
</compile_context>

<pallas_src>
import functools
import math

import jax
import jax.numpy as jnp
from jax.experimental import pallas as pl
from jax.experimental.pallas import tpu as pltpu


def _build_pe_table(max_len: int, d_model: int) -> jnp.ndarray:
    """Deterministic sinusoidal table, identical math to the PyTorch __init__."""
    position = jnp.arange(0, max_len, dtype=jnp.float32)[:, None]          # (L, 1)
    div_term = jnp.exp(
        jnp.arange(0, d_model, 2, dtype=jnp.float32)
        * (-math.log(10000.0) / d_model)
    )                                                                       # (D/2,)
    pe = jnp.zeros((max_len, d_model), dtype=jnp.float32)
    pe = pe.at[:, 0::2].set(jnp.sin(position * div_term))
    pe = pe.at[:, 1::2].set(jnp.cos(position * div_term))
    return pe                                                               # (L, D)


def _pe_add_kernel(x_ref, pe_ref, o_ref, *, B, D, p, training, seed):
    # x_ref / o_ref: (ts, B*D) tile (row-contiguous),  pe_ref: (ts, D) tile.
    pe = pe_ref[...].astype(jnp.float32)

    apply_dropout = bool(training) and 0.0 < p < 1.0
    drop_all = bool(training) and p >= 1.0
    if apply_dropout:
        # One seed per grid step; each prng_random_bits call below advances
        # the stateful PRNG, so every b-slice gets independent bits.
        # NOTE: with a fixed host `seed` the mask is deterministic across
        # calls; thread a fresh seed per call from the host if undesired.
        pltpu.prng_seed(seed + pl.program_id(0))
        thresh = jnp.uint32(min(int(round(p * (1 << 32))), (1 << 32) - 1))
        scale = jnp.float32(1.0 / (1.0 - p))

    # Static unroll over batch: each slice is a lane-offset (ts, D) add.
    for b in range(B):
        lo, hi = b * D, (b + 1) * D
        y = x_ref[:, lo:hi].astype(jnp.float32) + pe
        if drop_all:
            y = jnp.zeros_like(y)
        elif apply_dropout:
            bits = pltpu.bitcast(pltpu.prng_random_bits(y.shape), jnp.uint32)
            keep = bits >= thresh                     # P(keep) = 1 - p
            y = jnp.where(keep, y * scale, jnp.float32(0.0))
        o_ref[:, lo:hi] = y.astype(o_ref.dtype)


def _sublane_pack(dtype) -> int:
    return {4: 8, 2: 16, 1: 32}.get(jnp.dtype(dtype).itemsize, 8)


def _pick_rows(S: int, row_bytes: int, pack: int,
               target_bytes: int = 4 * 1024 * 1024) -> int:
    """Rows per block: ~target_bytes, multiple of `pack`, grid >= 2 when possible.

    target_bytes=4 MiB is safe on v7x (64 MiB VMEM); on v5e/v6e (128 MiB) it
    could be raised to 8-16 MiB for a ~1-2% gain.
    """
    ts = max(1, target_bytes // max(row_bytes, 1))
    if ts >= S:
        ts = S
        # Keep >= 2 grid steps so the "parallel" axis can shard across the two
        # v7x TensorCores (rows stay a multiple of the sublane pack).
        if S >= 2 * pack:
            half = -(-((S + 1) // 2) // pack) * pack
            ts = min(S, half)
    else:
        ts = max(pack, (ts // pack) * pack)
    return ts


def positional_encoding_forward(x, pos, pe, *, dropout_p=0.1, training=False, seed=0):
    """x: (S, B, D) float, pos: (S,) int32, pe: (max_len, D) float32."""
    S, B, D = x.shape
    pos = pos.astype(jnp.int32)

    # Tiny wrapper-side gather (S*D elems); cast to x.dtype to keep pe side
    # traffic at 1/B of the x traffic even for bf16 activations.
    # NOTE: jnp.take clamps out-of-range pos (PyTorch would raise).
    pe_g = jnp.take(pe, pos, axis=0).astype(x.dtype)          # (S, D)

    # Metadata-only flatten to a lane/sublane-dense 2-D layout.
    x2 = x.reshape(S, B * D)

    itemsize = jnp.dtype(x.dtype).itemsize
    pack = _sublane_pack(x.dtype)
    ts = _pick_rows(S, B * D * itemsize, pack)
    grid = (pl.cdiv(S, ts),)

    # Dense (un-padded) double-buffered footprint: x-in + pe-in + out blocks.
    blk_bytes = 2 * (2 * ts * B * D * itemsize + ts * D * itemsize) + (4 << 20)
    vmem_limit = int(min(max(blk_bytes, 16 << 20), 48 << 20))   # <= 48 MiB: v7x-safe

    kernel = functools.partial(
        _pe_add_kernel, B=B, D=D,
        p=float(dropout_p), training=bool(training), seed=int(seed),
    )

    out = pl.pallas_call(
        kernel,
        out_shape=jax.ShapeDtypeStruct((S, B * D), x.dtype),
        grid=grid,
        in_specs=[
            pl.BlockSpec((ts, B * D), lambda i: (i, 0)),
            pl.BlockSpec((ts, D), lambda i: (i, 0)),
        ],
        out_specs=pl.BlockSpec((ts, B * D), lambda i: (i, 0)),
        compiler_params=pltpu.CompilerParams(
            dimension_semantics=("parallel",),    # disjoint tiles -> 2 TCs on v7x
            vmem_limit_bytes=vmem_limit,
        ),
    )(x2, pe_g)

    return out.reshape(S, B, D)


if __name__ == "__main__":
    # Small, deterministic example shapes.
    S, B, D = 8, 2, 32
    MAX_LEN = 64
    DROPOUT_P = 0.1

    key = jax.random.PRNGKey(0)
    kx, kp = jax.random.split(key)
    x = jax.random.normal(kx, (S, B, D), dtype=jnp.float32)
    pos = jax.random.randint(kp, (S,), 0, MAX_LEN, dtype=jnp.int32)

    pe = _build_pe_table(MAX_LEN, D)

    # Eval-mode forward (dropout is identity in eval, matching module.eval()).
    # TODO(synk): training-mode dropout uses the TPU hardware PRNG, so its mask
    # differs bit-for-bit from torch.nn.Dropout's RNG stream (semantics match).
    out = positional_encoding_forward(
        x, pos, pe, dropout_p=DROPOUT_P, training=False
    )
    out = jax.block_until_ready(out)

    # Pure-JAX reference (eval mode): x + pe[pos][:, None, :]
    ref = x + pe[pos][:, None, :]
    assert out.shape == (S, B, D)
    assert jnp.allclose(out, ref, atol=1e-6, rtol=1e-6)

    print("KERNEL_OK")
</pallas_src>

<mosaic_0001>
module attributes {stable_mosaic.version = 11 : i64} {
  func.func @_pe_add_kernel(%arg0: i32, %arg1: memref<8x64xf32, #tpu.memory_space<vmem>>, %arg2: memref<8x32xf32, #tpu.memory_space<vmem>>, %arg3: memref<8x64xf32, #tpu.memory_space<vmem>>) attributes {dimension_semantics = [#tpu.dimension_semantics<parallel>], iteration_bounds = array<i64: 1>, scalar_prefetch = 0 : i64, scratch_operands = 0 : i64, tpu.core_type = #tpu.core_type<tc>, window_params = [{transform_indices = @transform_0, window_bounds = array<i64: 8, 64>}, {transform_indices = @transform_1, window_bounds = array<i64: 8, 32>}, {transform_indices = @transform_2, window_bounds = array<i64: 8, 64>}]} {
    %c0 = arith.constant 0 : index
    %c0_0 = arith.constant 0 : index
    %0 = vector.load %arg2[%c0, %c0_0] : memref<8x32xf32, #tpu.memory_space<vmem>>, vector<8x32xf32>
    %c0_1 = arith.constant 0 : index
    %c0_2 = arith.constant 0 : index
    %1 = vector.load %arg1[%c0_1, %c0_2] : memref<8x64xf32, #tpu.memory_space<vmem>>, vector<8x32xf32>
    %2 = arith.addf %1, %0 : vector<8x32xf32>
    %c0_3 = arith.constant 0 : index
    %c0_4 = arith.constant 0 : index
    %3 = vector.load %arg3[%c0_3, %c0_4] : memref<8x64xf32, #tpu.memory_space<vmem>>, vector<8x32xf32>
    tpu.vector_store %arg3[%c0_3, %c0_4], %2 {strides = array<i32>} : memref<8x64xf32, #tpu.memory_space<vmem>>, vector<8x32xf32>,
    %c0_5 = arith.constant 0 : index
    %c32 = arith.constant 32 : index
    %4 = vector.load %arg1[%c0_5, %c32] : memref<8x64xf32, #tpu.memory_space<vmem>>, vector<8x32xf32>
    %5 = arith.addf %4, %0 : vector<8x32xf32>
    %c0_6 = arith.constant 0 : index
    %c32_7 = arith.constant 32 : index
    %6 = vector.load %arg3[%c0_6, %c32_7] : memref<8x64xf32, #tpu.memory_space<vmem>>, vector<8x32xf32>
    tpu.vector_store %arg3[%c0_6, %c32_7], %5 {strides = array<i32>} : memref<8x64xf32, #tpu.memory_space<vmem>>, vector<8x32xf32>,
    return
  }
  func.func @transform_0(%arg0: i32) -> (i32, i32) {
    %c0_i32 = arith.constant 0 : i32
    %c0_i32_0 = arith.constant 0 : i32
    return %arg0, %c0_i32 : i32, i32
  }
  func.func @transform_1(%arg0: i32) -> (i32, i32) {
    %c0_i32 = arith.constant 0 : i32
    %c0_i32_0 = arith.constant 0 : i32
    return %arg0, %c0_i32 : i32, i32
  }
  func.func @transform_2(%arg0: i32) -> (i32, i32) {
    %c0_i32 = arith.constant 0 : i32
    %c0_i32_0 = arith.constant 0 : i32
    return %arg0, %c0_i32 : i32, i32
  }
}

</mosaic_0001>

<bundles_post_ra>
// kernel: tpu_custom_call.1
= control target key start
LH: loop header
LB: loop body
LE: loop exit
PB: predicated region body
PF: predicated region fallthrough
CT: control target
= control target key end

     0   :  { %7 = vsyncpa [#allocation3], 0  ;;  %s181_s0 = inlined_call_operand.hbm [shape: f32[8,64], index: 0, kind: input, shape index: {}]   ;;  %s182_s1 = inlined_call_operand.hbm [shape: f32[8,32], index: 1, kind: input, shape index: {}]   ;;  %s183_s2 = inlined_call_operand.hbm [shape: f32[8,64], index: 2, kind: output, shape index: {}]  }
   0x1   :  { %8 = vsyncpa [#allocation6], 0 }
   0x2   :  { %9 = vsyncpa [#allocation4], 0  ;;  %s15_s11 = sshll.u32 %s181_s0, 4  ;;  %s153_s12 = smov [#allocation2]   ;;  %s16_s11 = int_to_ptr.hbm [resolvable:$true] %s15_s11 }
   0x3   :  { %s17_s13 = sshll.u32 %s153_s12, 4  ;;  %s26_s16 = sshll.u32 %s182_s1, 4  ;;  %s18_s13 = int_to_ptr.vmem [resolvable:$true] %s17_s13  ;;  %s27_s16 = int_to_ptr.hbm [resolvable:$true] %s26_s16 }
   0x4   :  { %20 = dma.hbm_to_vmem [thread:$0]  %s16_s11, 128, %s18_s13, [#allocation3]  }
   0x5   :  { %s154_s17 = smov [#allocation5]  }
   0x6   :  { %s28_s18 = sshll.u32 %s154_s17, 4  ;;  %s29_s18 = int_to_ptr.vmem [resolvable:$true] %s28_s18 }
   0x7   :  { %31 = dma.hbm_to_vmem [thread:$0]  %s27_s16, 128, %s29_s18, [#allocation6]  }
   0x8   :  { %147 = dma.done.wait [#allocation3], 128  }
   0x9   :  { %148 = vsyncadd [#allocation3], 4294967168 }
   0xa   :  { %149 = dma.done.wait [#allocation6], 128  }
   0xb   :  { %150 = vsyncadd [#allocation6], 4294967168  ;;  %v40_v0 = vld [vmem:[#allocation5] sm:$0xff]  ;;  %v41_v1 = vld [vmem:[#allocation2] sm:$0xff]  ;;  %vm43_vm0 = vcmask 261120   ;;  %s155_s0 = smov 32  }
   0xc   :  { %v42_v2 = vadd.f32 %v41_v1, %v40_v0  ;;  %47 = vrot.lane.b32.xlu0 %v40_v0, %s155_s0  ;;  %s156_s19 = smov [#allocation7]   ;;  %s60_s22 = sshll.u32 %s183_s2, 4  ;;  %vm51_vm1 = vcmask 523520   ;;  %s61_s22 = int_to_ptr.hbm [resolvable:$true] %s60_s22 }
   0xd   :  { %s58_s20 = sshll.u32 %s156_s19, 4  ;;  %s59_s20 = int_to_ptr.vmem [resolvable:$true] %s58_s20 }
   0xe   :  { %44 = vst.msk [vmem:[#allocation7] sm:$0xff] %vm43_vm0, %v42_v2 }
  0x7e   :  { %v48_v3 = vpop.permute.xlu0 %47 }
  0x7f   :  { %v50_v4 = vadd.f32 %v48_v3, %v41_v1 }
  0x81   :  { %52 = vst.msk [vmem:[#allocation7] sm:$0xff] %vm51_vm1, %v50_v4 }
  0x82   :  { %63 = dma.vmem_to_hbm [thread:$0]  %s59_s20, 128, %s61_s22, [#allocation4]  }
  0x83   :  { %151 = dma.done.wait [#allocation4], 128  }
  0x84   :  { %152 = vsyncadd [#allocation4], 4294967168 }
  0x85   :  { %68 = vsyncpa [#allocation3], 1 }
  0x86   :  { %69 = vsyncpa [#allocation6], 1 }
  0x87   :  { %70 = vsyncpa [#allocation4], 1 }

</bundles_post_ra>
